<compile_context>
chip_gen: v6e
topology: v6e:2x2x1
jax: 0.10.0
libtpu: 0.0.40
codegen_flags: <defaults>
</compile_context>

<pallas_src>
import jax
import jax.numpy as jnp
from jax.experimental import pallas as pl
from jax.experimental.pallas import tpu as pltpu

D_IN = 784
D_LATENT = 20
L_PAD = 128            # latent padded to a full 128-lane tile
MAX_BATCH_TILE = 2048  # rows per grid step (see VMEM math in header)
MIN_BATCH_TILE = 256   # don't split below this just to occupy both v7x TCs
VMEM_LIMIT_BYTES = 48 * 1024 * 1024


def _round_up(n, m):
    return ((n + m - 1) // m) * m


def _choose_batch_tile(batch, max_tile=MAX_BATCH_TILE, min_tile=MIN_BATCH_TILE):
    """Balanced batch tile: multiple of 8, waste bounded, >=2 tiles when big."""
    b8 = _round_up(max(batch, 1), 8)
    n = pl.cdiv(b8, max_tile)
    # Give v7x's two TensorCores something to split once the batch is large
    # enough to keep per-tile work above MIN_BATCH_TILE rows.
    n = max(n, min(2, b8 // min_tile))
    # Even tile count balances the two cores when they shard the grid.
    if n > 1 and n % 2 == 1:
        n += 1
    tb = _round_up(pl.cdiv(b8, n), 8)
    return max(8, min(tb, b8))


def beta_vae_kernel(x_ref, w_enc_ref, w_dec_ref, b_eff_ref, out_ref):
    # latent_nobias = x @ W_enc_pad          (TB, 784) @ (784, 128) -> (TB, 128)
    latent = jnp.dot(
        x_ref[...], w_enc_ref[...], preferred_element_type=jnp.float32
    )
    # recon = latent_nobias @ W_dec_pad + b_eff
    #       = (x @ W_enc + b_enc) @ W_dec + b_dec   (bias folded in prepare_params)
    recon = jnp.dot(
        latent, w_dec_ref[...], preferred_element_type=jnp.float32
    ) + b_eff_ref[...]
    out_ref[...] = recon.astype(out_ref.dtype)


def prepare_params(w_enc, b_enc, w_dec, b_dec, dtype=jnp.float32):
    """One-time (init-time) weight padding + bias folding.

    w_enc: (784, 20)  (PyTorch enc.weight transposed)
    b_enc: (1, 20)
    w_dec: (20, 784)  (PyTorch dec.weight transposed)
    b_dec: (1, 784)
    Returns (w_enc_p (784,128), w_dec_p (128,784), b_eff (1,784)).
    """
    w_enc_p = jnp.zeros((D_IN, L_PAD), dtype).at[:, :D_LATENT].set(w_enc.astype(dtype))
    w_dec_p = jnp.zeros((L_PAD, D_IN), dtype).at[:D_LATENT, :].set(w_dec.astype(dtype))
    b_eff = (b_enc.astype(jnp.float32) @ w_dec.astype(jnp.float32)
             + b_dec.astype(jnp.float32)).reshape(1, D_IN).astype(dtype)
    return w_enc_p, w_dec_p, b_eff


def beta_vae_forward(x, w_enc_p, w_dec_p, b_eff):
    """Forward pass: x (B, 784) f32 -> (B, 784) f32.  Params from prepare_params."""
    B = x.shape[0]
    dtype = x.dtype

    tb = _choose_batch_tile(B)
    grid = (pl.cdiv(B, tb),)   # final block may be partial; no jnp.pad / out slice

    cost = pl.CostEstimate(
        flops=4 * B * D_IN * L_PAD,   # two matmuls, 2 flops/MAC
        transcendentals=0,
        bytes_accessed=(B * D_IN * x.dtype.itemsize        # x stream
                        + B * D_IN * x.dtype.itemsize      # out stream
                        + (D_IN * L_PAD * 2 + D_IN) * 4),  # resident weights
    )

    return pl.pallas_call(
        beta_vae_kernel,
        out_shape=jax.ShapeDtypeStruct((B, D_IN), dtype),
        grid=grid,
        in_specs=[
            pl.BlockSpec((tb, D_IN), lambda i: (i, 0)),       # x: streamed per tile
            pl.BlockSpec((D_IN, L_PAD), lambda i: (0, 0)),    # w_enc: VMEM-resident
            pl.BlockSpec((L_PAD, D_IN), lambda i: (0, 0)),    # w_dec: VMEM-resident
            pl.BlockSpec((1, D_IN), lambda i: (0, 0)),        # b_eff: VMEM-resident
        ],
        out_specs=pl.BlockSpec((tb, D_IN), lambda i: (i, 0)),
        compiler_params=pltpu.CompilerParams(
            dimension_semantics=("parallel",),
            vmem_limit_bytes=VMEM_LIMIT_BYTES,
        ),
        cost_estimate=cost,
    )(x, w_enc_p, w_dec_p, b_eff)


def init_params(key):
    """Deterministic init mirroring nn.Linear's U(-1/sqrt(fan_in), 1/sqrt(fan_in)).

    Weights are stored transposed relative to PyTorch: (in_features, out_features).
    """
    k1, k2, k3, k4 = jax.random.split(key, 4)
    bound_enc = 1.0 / jnp.sqrt(jnp.float32(D_IN))
    bound_dec = 1.0 / jnp.sqrt(jnp.float32(D_LATENT))
    w_enc = jax.random.uniform(k1, (D_IN, D_LATENT), jnp.float32,
                               -bound_enc, bound_enc)
    b_enc = jax.random.uniform(k2, (1, D_LATENT), jnp.float32,
                               -bound_enc, bound_enc)
    w_dec = jax.random.uniform(k3, (D_LATENT, D_IN), jnp.float32,
                               -bound_dec, bound_dec)
    b_dec = jax.random.uniform(k4, (1, D_IN), jnp.float32,
                               -bound_dec, bound_dec)
    return w_enc, b_enc, w_dec, b_dec


if __name__ == "__main__":
    key = jax.random.PRNGKey(0)
    k_params, k_x = jax.random.split(key)

    w_enc, b_enc, w_dec, b_dec = init_params(k_params)
    # One-time parameter preparation (equivalent of module __init__).
    w_enc_p, w_dec_p, b_eff = prepare_params(w_enc, b_enc, w_dec, b_dec)

    B = 8
    x = jax.random.normal(k_x, (B, D_IN), jnp.float32)

    fwd = jax.jit(beta_vae_forward)
    out = jax.block_until_ready(fwd(x, w_enc_p, w_dec_p, b_eff))

    # Reference: same math as the PyTorch module (two unfused linears).
    ref = (x @ w_enc + b_enc) @ w_dec + b_dec
    assert out.shape == (B, D_IN)
    assert jnp.allclose(out, ref, atol=1e-4, rtol=1e-4)

    print("KERNEL_OK")
</pallas_src>

<mosaic_0001>
module attributes {stable_mosaic.version = 11 : i64} {
  func.func @beta_vae_kernel(%arg0: i32, %arg1: memref<8x784xf32, #tpu.memory_space<vmem>>, %arg2: memref<784x128xf32, #tpu.memory_space<vmem>>, %arg3: memref<128x784xf32, #tpu.memory_space<vmem>>, %arg4: memref<1x784xf32, #tpu.memory_space<vmem>>, %arg5: memref<8x784xf32, #tpu.memory_space<vmem>>) attributes {dimension_semantics = [#tpu.dimension_semantics<parallel>], iteration_bounds = array<i64: 1>, scalar_prefetch = 0 : i64, scratch_operands = 0 : i64, tpu.core_type = #tpu.core_type<tc>, window_params = [{transform_indices = @transform_0, window_bounds = array<i64: 8, 784>}, {pipeline_mode = #tpu.pipeline_mode<synchronous>, transform_indices = @transform_1, window_bounds = array<i64: 784, 128>}, {pipeline_mode = #tpu.pipeline_mode<synchronous>, transform_indices = @transform_2, window_bounds = array<i64: 128, 784>}, {pipeline_mode = #tpu.pipeline_mode<synchronous>, transform_indices = @transform_3, window_bounds = array<i64: 1, 784>}, {transform_indices = @transform_4, window_bounds = array<i64: 8, 784>}]} {
    %c0 = arith.constant 0 : index
    %c0_0 = arith.constant 0 : index
    %0 = vector.load %arg1[%c0, %c0_0] : memref<8x784xf32, #tpu.memory_space<vmem>>, vector<8x784xf32>
    %c0_1 = arith.constant 0 : index
    %c0_2 = arith.constant 0 : index
    %1 = vector.load %arg2[%c0_1, %c0_2] : memref<784x128xf32, #tpu.memory_space<vmem>>, vector<784x128xf32>
    %cst = arith.constant dense<0.000000e+00> : vector<8x128xf32>
    %2 = tpu.matmul %0, %1, %cst {dimension_numbers = #tpu.dot_dimension_numbers<[1], [0], [0], [1], [0, 0, 1, 1], [], []>} : vector<8x784xf32>, vector<784x128xf32>, vector<8x128xf32> -> vector<8x128xf32>
    %c0_3 = arith.constant 0 : index
    %c0_4 = arith.constant 0 : index
    %3 = vector.load %arg3[%c0_3, %c0_4] : memref<128x784xf32, #tpu.memory_space<vmem>>, vector<128x784xf32>
    %cst_5 = arith.constant dense<0.000000e+00> : vector<8x784xf32>
    %4 = tpu.matmul %2, %3, %cst_5 {dimension_numbers = #tpu.dot_dimension_numbers<[1], [0], [0], [1], [0, 0, 1, 1], [], []>} : vector<8x128xf32>, vector<128x784xf32>, vector<8x784xf32> -> vector<8x784xf32>
    %c0_6 = arith.constant 0 : index
    %c0_7 = arith.constant 0 : index
    %5 = vector.load %arg4[%c0_6, %c0_7] : memref<1x784xf32, #tpu.memory_space<vmem>>, vector<1x784xf32>
    %6 = vector.broadcast %5 : vector<1x784xf32> to vector<8x784xf32>
    %7 = arith.addf %4, %6 : vector<8x784xf32>
    %c0_8 = arith.constant 0 : index
    %c0_9 = arith.constant 0 : index
    %8 = vector.load %arg5[%c0_8, %c0_9] : memref<8x784xf32, #tpu.memory_space<vmem>>, vector<8x784xf32>
    tpu.vector_store %arg5[%c0_8, %c0_9], %7 {strides = array<i32>} : memref<8x784xf32, #tpu.memory_space<vmem>>, vector<8x784xf32>,
    return
  }
  func.func @transform_0(%arg0: i32) -> (i32, i32) {
    %c0_i32 = arith.constant 0 : i32
    %c0_i32_0 = arith.constant 0 : i32
    return %arg0, %c0_i32 : i32, i32
  }
  func.func @transform_1(%arg0: i32) -> (i32, i32) {
    %c0_i32 = arith.constant 0 : i32
    %c0_i32_0 = arith.constant 0 : i32
    %c0_i32_1 = arith.constant 0 : i32
    return %c0_i32, %c0_i32_0 : i32, i32
  }
  func.func @transform_2(%arg0: i32) -> (i32, i32) {
    %c0_i32 = arith.constant 0 : i32
    %c0_i32_0 = arith.constant 0 : i32
    %c0_i32_1 = arith.constant 0 : i32
    return %c0_i32, %c0_i32_0 : i32, i32
  }
  func.func @transform_3(%arg0: i32) -> (i32, i32) {
    %c0_i32 = arith.constant 0 : i32
    %c0_i32_0 = arith.constant 0 : i32
    %c0_i32_1 = arith.constant 0 : i32
    return %c0_i32, %c0_i32_0 : i32, i32
  }
  func.func @transform_4(%arg0: i32) -> (i32, i32) {
    %c0_i32 = arith.constant 0 : i32
    %c0_i32_0 = arith.constant 0 : i32
    return %arg0, %c0_i32 : i32, i32
  }
}

</mosaic_0001>

<bundles_post_ra>
// kernel: beta_vae_forward.1
= control target key start
LH: loop header
LB: loop body
LE: loop exit
PB: predicated region body
PF: predicated region fallthrough
CT: control target
= control target key end

     0   :  { %s1771_s0 = inlined_call_operand.vmem [shape: f32[8,784], index: 0, kind: input, shape index: {}]   ;;  %s1772_s1 = inlined_call_operand.vmem [shape: f32[784,128], index: 1, kind: input, shape index: {}]   ;;  %s1773_s2 = inlined_call_operand.vmem [shape: f32[128,784], index: 2, kind: input, shape index: {}]   ;;  %s1774_s3 = inlined_call_operand.vmem [shape: f32[1,784], index: 3, kind: input, shape index: {}]   ;;  %s1775_s4 = inlined_call_operand.hbm [shape: f32[8,784], index: 4, kind: output, shape index: {}]  }
   0x1   :  { %v56_v0 = vld [vmem:[%s1772_s1 + $0xf8] sm:$0xff]  ;;  %v55_v4 = vld [vmem:[%s1772_s1 + $0xf0] sm:$0xff]  ;;  %v54_v8 = vld [vmem:[%s1772_s1 + $0xe8] sm:$0xff] }
   0x2   :  { %v88_v1 = vld [vmem:[%s1772_s1 + $0x1f8] sm:$0xff]  ;;  %861 = vmatprep.subr.mxu0 %v56_v0  ;;  %v87_v5 = vld [vmem:[%s1772_s1 + $0x1f0] sm:$0xff]  ;;  %v86_v9 = vld [vmem:[%s1772_s1 + $0x1e8] sm:$0xff] }
   0x3   :  { %v40_v2 = vld [vmem:[%s1772_s1 + $0x78] sm:$0xff]  ;;  %896 = vmatprep.subr.mxu1 %v88_v1  ;;  %v39_v6 = vld [vmem:[%s1772_s1 + $0x70] sm:$0xff]  ;;  %v38_v10 = vld [vmem:[%s1772_s1 + $0x68] sm:$0xff] }
   0x4   :  { %v72_v3 = vld [vmem:[%s1772_s1 + $0x178] sm:$0xff]  ;;  %862 = vmatpush3.msra.mxu0 %v40_v2  ;;  %v71_v7 = vld [vmem:[%s1772_s1 + $0x170] sm:$0xff]  ;;  %v70_v11 = vld [vmem:[%s1772_s1 + $0x168] sm:$0xff] }
   0x5   :  { %897 = vmatpush3.msra.mxu1 %v72_v3  ;;  %863 = vmatprep.subr.mxu0 %v55_v4  ;;  %v53_v12 = vld [vmem:[%s1772_s1 + $0xe0] sm:$0xff]  ;;  %v52_v16 = vld [vmem:[%s1772_s1 + $0xd8] sm:$0xff]  ;;  %v51_v20 = vld [vmem:[%s1772_s1 + $0xd0] sm:$0xff] }
   0x6   :  { %898 = vmatprep.subr.mxu1 %v87_v5  ;;  %864 = vmatpush3.msra.mxu0 %v39_v6  ;;  %v85_v13 = vld [vmem:[%s1772_s1 + $0x1e0] sm:$0xff]  ;;  %v84_v17 = vld [vmem:[%s1772_s1 + $0x1d8] sm:$0xff]  ;;  %v83_v21 = vld [vmem:[%s1772_s1 + $0x1d0] sm:$0xff] }
   0x7   :  { %899 = vmatpush3.msra.mxu1 %v71_v7  ;;  %865 = vmatprep.subr.mxu0 %v54_v8  ;;  %v37_v14 = vld [vmem:[%s1772_s1 + $0x60] sm:$0xff]  ;;  %v36_v18 = vld [vmem:[%s1772_s1 + $0x58] sm:$0xff]  ;;  %v35_v22 = vld [vmem:[%s1772_s1 + $0x50] sm:$0xff] }
   0x8   :  { %900 = vmatprep.subr.mxu1 %v86_v9  ;;  %v69_v15 = vld [vmem:[%s1772_s1 + $0x160] sm:$0xff]  ;;  %866 = vmatpush3.msra.mxu0 %v38_v10  ;;  %v68_v19 = vld [vmem:[%s1772_s1 + $0x158] sm:$0xff]  ;;  %v67_v23 = vld [vmem:[%s1772_s1 + $0x150] sm:$0xff] }
   0x9   :  { %901 = vmatpush3.msra.mxu1 %v70_v11  ;;  %867 = vmatprep.subr.mxu0 %v53_v12  ;;  %v50_v24 = vld [vmem:[%s1772_s1 + $0xc8] sm:$0xff]  ;;  %v49_v28 = vld [vmem:[%s1772_s1 + $0xc0] sm:$0xff]  ;;  %v48_v32 = vld [vmem:[%s1772_s1 + $0xb8] sm:$0xff] }
   0xa   :  { %902 = vmatprep.subr.mxu1 %v85_v13  ;;  %868 = vmatpush3.msra.mxu0 %v37_v14  ;;  %v82_v25 = vld [vmem:[%s1772_s1 + $0x1c8] sm:$0xff]  ;;  %v81_v29 = vld [vmem:[%s1772_s1 + $0x1c0] sm:$0xff]  ;;  %v80_v33 = vld [vmem:[%s1772_s1 + $0x1b8] sm:$0xff] }
   0xb   :  { %903 = vmatpush3.msra.mxu1 %v69_v15  ;;  %869 = vmatprep.subr.mxu0 %v52_v16  ;;  %v34_v26 = vld [vmem:[%s1772_s1 + $0x48] sm:$0xff]  ;;  %v33_v30 = vld [vmem:[%s1772_s1 + $0x40] sm:$0xff]  ;;  %v32_v34 = vld [vmem:[%s1772_s1 + $0x38] sm:$0xff] }
   0xc   :  { %904 = vmatprep.subr.mxu1 %v84_v17  ;;  %870 = vmatpush3.msra.mxu0 %v36_v18  ;;  %v66_v27 = vld [vmem:[%s1772_s1 + $0x148] sm:$0xff]  ;;  %v65_v31 = vld [vmem:[%s1772_s1 + $0x140] sm:$0xff]  ;;  %v64_v35 = vld [vmem:[%s1772_s1 + $0x138] sm:$0xff] }
   0xd   :  { %905 = vmatpush3.msra.mxu1 %v68_v19  ;;  %871 = vmatprep.subr.mxu0 %v51_v20  ;;  %v47_v36 = vld [vmem:[%s1772_s1 + $0xb0] sm:$0xff]  ;;  %v46_v40 = vld [vmem:[%s1772_s1 + $0xa8] sm:$0xff]  ;;  %v45_v44 = vld [vmem:[%s1772_s1 + $0xa0] sm:$0xff] }
   0xe   :  { %906 = vmatprep.subr.mxu1 %v83_v21  ;;  %872 = vmatpush3.msra.mxu0 %v35_v22  ;;  %v79_v37 = vld [vmem:[%s1772_s1 + $0x1b0] sm:$0xff]  ;;  %v78_v41 = vld [vmem:[%s1772_s1 + $0x1a8] sm:$0xff]  ;;  %v77_v45 = vld [vmem:[%s1772_s1 + $0x1a0] sm:$0xff] }
   0xf   :  { %907 = vmatpush3.msra.mxu1 %v67_v23  ;;  %873 = vmatprep.subr.mxu0 %v50_v24  ;;  %v31_v38 = vld [vmem:[%s1772_s1 + $0x30] sm:$0xff]  ;;  %v30_v42 = vld [vmem:[%s1772_s1 + $0x28] sm:$0xff]  ;;  %v29_v46 = vld [vmem:[%s1772_s1 + $0x20] sm:$0xff] }
  0x10   :  { %908 = vmatprep.subr.mxu1 %v82_v25  ;;  %874 = vmatpush3.msra.mxu0 %v34_v26  ;;  %v63_v39 = vld [vmem:[%s1772_s1 + $0x130] sm:$0xff]  ;;  %v62_v43 = vld [vmem:[%s1772_s1 + $0x128] sm:$0xff]  ;;  %v61_v47 = vld [vmem:[%s1772_s1 + $0x120] sm:$0xff] }
  0x11   :  { %909 = vmatpush3.msra.mxu1 %v66_v27  ;;  %875 = vmatprep.subr.mxu0 %v49_v28  ;;  %v44_v48 = vld [vmem:[%s1772_s1 + $0x98] sm:$0xff]  ;;  %v43_v52 = vld [vmem:[%s1772_s1 + $0x90] sm:$0xff]  ;;  %v42_v56 = vld [vmem:[%s1772_s1 + $0x88] sm:$0xff] }
  0x12   :  { %910 = vmatprep.subr.mxu1 %v81_v29  ;;  %876 = vmatpush3.msra.mxu0 %v33_v30  ;;  %v76_v49 = vld [vmem:[%s1772_s1 + $0x198] sm:$0xff]  ;;  %v75_v53 = vld [vmem:[%s1772_s1 + $0x190] sm:$0xff]  ;;  %v74_v57 = vld [vmem:[%s1772_s1 + $0x188] sm:$0xff] }
  0x13   :  { %911 = vmatpush3.msra.mxu1 %v65_v31  ;;  %877 = vmatprep.subr.mxu0 %v48_v32  ;;  %v28_v50 = vld [vmem:[%s1772_s1 + $0x18] sm:$0xff]  ;;  %v27_v54 = vld [vmem:[%s1772_s1 + $0x10] sm:$0xff]  ;;  %v26_v58 = vld [vmem:[%s1772_s1 + $0x8] sm:$0xff] }
  0x14   :  { %912 = vmatprep.subr.mxu1 %v80_v33  ;;  %878 = vmatpush3.msra.mxu0 %v32_v34  ;;  %v60_v51 = vld [vmem:[%s1772_s1 + $0x118] sm:$0xff]  ;;  %v59_v55 = vld [vmem:[%s1772_s1 + $0x110] sm:$0xff]  ;;  %v58_v59 = vld [vmem:[%s1772_s1 + $0x108] sm:$0xff] }
  0x15   :  { %913 = vmatpush3.msra.mxu1 %v64_v35  ;;  %879 = vmatprep.subr.mxu0 %v47_v36  ;;  %v41_v60 = vld [vmem:[%s1772_s1 + $0x80] sm:$0xff]  ;;  %v19_v63 = vld [vmem:[%s1771_s0 + $0x8] sm:$0xff]  ;;  %v21_v1 = vld [vmem:[%s1771_s0 + $0x18] sm:$0xff] }
  0x16   :  { %914 = vmatprep.subr.mxu1 %v79_v37  ;;  %880 = vmatpush3.msra.mxu0 %v31_v38  ;;  %v73_v61 = vld [vmem:[%s1772_s1 + $0x180] sm:$0xff]  ;;  %v20_v3 = vld [vmem:[%s1771_s0 + $0x10] sm:$0xff]  ;;  %v120_v4 = vld [vmem:[%s1772_s1 + $0x2f8] sm:$0xff] }
  0x17   :  { %915 = vmatpush3.msra.mxu1 %v63_v39  ;;  %881 = vmatprep.subr.mxu0 %v46_v40  ;;  %v25_v62 = vld [vmem:[%s1772_s1] sm:$0xff]  ;;  %v104_v5 = vld [vmem:[%s1772_s1 + $0x278] sm:$0xff]  ;;  %v23_v6 = vld [vmem:[%s1771_s0 + $0x28] sm:$0xff] }
  0x18   :  { %916 = vmatprep.subr.mxu1 %v78_v41  ;;  %882 = vmatpush3.msra.mxu0 %v30_v42  ;;  %v57_v0 = vld [vmem:[%s1772_s1 + $0x100] sm:$0xff]  ;;  %v119_v7 = vld [vmem:[%s1772_s1 + $0x2f0] sm:$0xff]  ;;  %v122_v8 = vld [vmem:[%s1772_s1 + $0x308] sm:$0xff] }
  0x19   :  { %917 = vmatpush3.msra.mxu1 %v62_v43  ;;  %883 = vmatprep.subr.mxu0 %v45_v44  ;;  %v18_v2 = vld [vmem:[%s1771_s0] sm:$0xff]  ;;  %v103_v9 = vld [vmem:[%s1772_s1 + $0x270] sm:$0xff] }
  0x1a   :  { %918 = vmatprep.subr.mxu1 %v77_v45  ;;  %884 = vmatpush3.msra.mxu0 %v29_v46 }
  0x1b   :  { %919 = vmatpush3.msra.mxu1 %v61_v47  ;;  %885 = vmatprep.subr.mxu0 %v44_v48 }
  0x1c   :  { %920 = vmatprep.subr.mxu1 %v76_v49  ;;  %886 = vmatpush3.msra.mxu0 %v28_v50 }
  0x1d   :  { %921 = vmatpush3.msra.mxu1 %v60_v51  ;;  %887 = vmatprep.subr.mxu0 %v43_v52 }
  0x1e   :  { %922 = vmatprep.subr.mxu1 %v75_v53  ;;  %888 = vmatpush3.msra.mxu0 %v27_v54 }
  0x1f   :  { %923 = vmatpush3.msra.mxu1 %v59_v55  ;;  %889 = vmatprep.subr.mxu0 %v42_v56 }
  0x20   :  { %924 = vmatprep.subr.mxu1 %v74_v57  ;;  %890 = vmatpush3.msra.mxu0 %v26_v58 }
  0x21   :  { %925 = vmatpush3.msra.mxu1 %v58_v59  ;;  %891 = vmatprep.subr.mxu0 %v41_v60 }
  0x22   :  { %926 = vmatprep.subr.mxu1 %v73_v61  ;;  %892 = vmatpush3.msra.mxu0 %v25_v62 }
  0x23   :  { %191 = vmatprep.mubr.f32.mxu0 %v19_v63  ;;  %927 = vmatpush3.msra.mxu1 %v57_v0 }
  0x24   :  { %261 = vmatprep.mubr.f32.mxu1 %v21_v1  ;;  %192 = vmatmul.mubr.f32.vlgmr.msra.gmra.mxu0 %v18_v2 }
  0x25   :  { %262 = vmatmul.mubr.f32.vlgmr.msra.gmra.mxu1 %v20_v3  ;;  %931 = vmatprep.subr.mxu0 %v120_v4 }
  0x26   :  { %331 = vmatprep.mubr.f32.mxu0 %v23_v6 }
  0x27   :  { %9 = vsyncpa [#allocation3], 0  ;;  %932 = vmatpush3.msra.mxu0 %v104_v5  ;;  %v118_v10 = vld [vmem:[%s1772_s1 + $0x2e8] sm:$0xff]  ;;  %v1053_v11 = vmov 0.0   ;;  %v121_v12 = vld [vmem:[%s1772_s1 + $0x300] sm:$0xff]  ;;  %vm123_vm0 = vcmask 130048  }
  0x28   :  { %986 = vmatprep.subr.mxu1 %v1053_v11  ;;  %933 = vmatprep.subr.mxu0 %v119_v7  ;;  %v102_v13 = vld [vmem:[%s1772_s1 + $0x268] sm:$0xff]  ;;  %v117_v14 = vld [vmem:[%s1772_s1 + $0x2e0] sm:$0xff]  ;;  %v24_v15 = vld [vmem:[%s1771_s0 + $0x30] sm:$0xff]  ;;  %vm1054_vm1 = vmmov 0  }
  0x29   :  { %987 = vmatpush3.msra.mxu1 %v122_v8  ;;  %934 = vmatpush3.msra.mxu0 %v103_v9  ;;  %v101_v16 = vld [vmem:[%s1772_s1 + $0x260] sm:$0xff]  ;;  %v116_v17 = vld [vmem:[%s1772_s1 + $0x2d8] sm:$0xff]  ;;  %v115_v19 = vld [vmem:[%s1772_s1 + $0x2d0] sm:$0xff] }
  0x2a   :  { %988 = vmatprep.subr.mxu1 %v1053_v11  ;;  %935 = vmatprep.subr.mxu0 %v118_v10  ;;  %v100_v18 = vld [vmem:[%s1772_s1 + $0x258] sm:$0xff]  ;;  %v99_v20 = vld [vmem:[%s1772_s1 + $0x250] sm:$0xff]  ;;  %v114_v21 = vld [vmem:[%s1772_s1 + $0x2c8] sm:$0xff] }
  0x2b   :  { %989 = vmatpush3.msra.mxu1 %v121_v12  ;;  %936 = vmatpush3.msra.mxu0 %v102_v13  ;;  %v98_v22 = vld [vmem:[%s1772_s1 + $0x248] sm:$0xff]  ;;  %v113_v23 = vld [vmem:[%s1772_s1 + $0x2c0] sm:$0xff]  ;;  %v112_v25 = vld [vmem:[%s1772_s1 + $0x2b8] sm:$0xff] }
  0x2c   :  { %990 = vmatprep.mubr.msk.f32.mxu1 %vm1054_vm1, %v1053_v11  ;;  %937 = vmatprep.subr.mxu0 %v117_v14  ;;  %v97_v24 = vld [vmem:[%s1772_s1 + $0x240] sm:$0xff]  ;;  %v96_v26 = vld [vmem:[%s1772_s1 + $0x238] sm:$0xff]  ;;  %v111_v27 = vld [vmem:[%s1772_s1 + $0x2b0] sm:$0xff] }
  0x2d   :  { %991 = vmatmul.mubr.msk.f32.vlgmr.msra.gmra.mxu1 %vm123_vm0, %v24_v15  ;;  %938 = vmatpush3.msra.mxu0 %v101_v16  ;;  %v95_v28 = vld [vmem:[%s1772_s1 + $0x230] sm:$0xff]  ;;  %v110_v29 = vld [vmem:[%s1772_s1 + $0x2a8] sm:$0xff]  ;;  %v109_v31 = vld [vmem:[%s1772_s1 + $0x2a0] sm:$0xff] }
  0x2e   :  { %620 = vmatprep.mubr.f32.mxu1 %v1053_v11  ;;  %939 = vmatprep.subr.mxu0 %v116_v17  ;;  %v94_v30 = vld [vmem:[%s1772_s1 + $0x228] sm:$0xff]  ;;  %v93_v32 = vld [vmem:[%s1772_s1 + $0x220] sm:$0xff]  ;;  %v108_v33 = vld [vmem:[%s1772_s1 + $0x298] sm:$0xff] }
  0x2f   :  { %940 = vmatpush3.msra.mxu0 %v100_v18  ;;  %v92_v34 = vld [vmem:[%s1772_s1 + $0x218] sm:$0xff]  ;;  %v107_v35 = vld [vmem:[%s1772_s1 + $0x290] sm:$0xff]  ;;  %v106_v37 = vld [vmem:[%s1772_s1 + $0x288] sm:$0xff] }
  0x30   :  { %941 = vmatprep.subr.mxu0 %v115_v19  ;;  %v91_v36 = vld [vmem:[%s1772_s1 + $0x210] sm:$0xff]  ;;  %v90_v38 = vld [vmem:[%s1772_s1 + $0x208] sm:$0xff]  ;;  %v105_v39 = vld [vmem:[%s1772_s1 + $0x280] sm:$0xff] }
  0x31   :  { %942 = vmatpush3.msra.mxu0 %v99_v20  ;;  %v89_v40 = vld [vmem:[%s1772_s1 + $0x200] sm:$0xff]  ;;  %v513_v42 = vld [vmem:[%s1773_s2 + $0x350] sm:$0xff]  ;;  %v512_v44 = vld [vmem:[%s1773_s2 + $0x348] sm:$0xff] }
  0x32   :  { %943 = vmatprep.subr.mxu0 %v114_v21  ;;  %v22_v41 = vld [vmem:[%s1771_s0 + $0x20] sm:$0xff]  ;;  %556 = vmatprep.subr.mxu1 %v513_v42  ;;  %v514_v45 = vld [vmem:[%s1773_s2 + $0x358] sm:$0xff]  ;;  %v508_v47 = vld [vmem:[%s1773_s2 + $0x328] sm:$0xff] }
  0x33   :  { %944 = vmatpush3.msra.mxu0 %v98_v22  ;;  %v515_v43 = vld [vmem:[%s1773_s2 + $0x360] sm:$0xff]  ;;  %v506_v46 = vld [vmem:[%s1773_s2 + $0x318] sm:$0xff]  ;;  %557 = vmatpush1.msra.mxu1 %v512_v44  ;;  %v505_v48 = vld [vmem:[%s1773_s2 + $0x310] sm:$0xff] }
  0x34   :  { %945 = vmatprep.subr.mxu0 %v113_v23  ;;  %v507_v49 = vld [vmem:[%s1773_s2 + $0x320] sm:$0xff]  ;;  %558 = vmatprep.subr.mxu1 %v506_v46  ;;  %v501_v51 = vld [vmem:[%s1773_s2 + $0x2f0] sm:$0xff]  ;;  %v498_v52 = vld [vmem:[%s1773_s2 + $0x2d8] sm:$0xff] }
  0x35   :  { %946 = vmatpush3.msra.mxu0 %v97_v24  ;;  %v499_v50 = vld [vmem:[%s1773_s2 + $0x2e0] sm:$0xff]  ;;  %v500_v53 = vld [vmem:[%s1773_s2 + $0x2e8] sm:$0xff]  ;;  %559 = vmatpush1.msra.mxu1 %v505_v48  ;;  %v494_v55 = vld [vmem:[%s1773_s2 + $0x2b8] sm:$0xff] }
  0x36   :  { %947 = vmatprep.subr.mxu0 %v112_v25  ;;  %v492_v54 = vld [vmem:[%s1773_s2 + $0x2a8] sm:$0xff]  ;;  %560 = vmatprep.subr.mxu1 %v499_v50  ;;  %v491_v56 = vld [vmem:[%s1773_s2 + $0x2a0] sm:$0xff]  ;;  %v493_v57 = vld [vmem:[%s1773_s2 + $0x2b0] sm:$0xff] }
  0x37   :  { %948 = vmatpush3.msra.mxu0 %v96_v26  ;;  %561 = vmatpush1.msra.mxu1 %v498_v52  ;;  %v485_v58 = vld [vmem:[%s1773_s2 + $0x270] sm:$0xff]  ;;  %v487_v59 = vld [vmem:[%s1773_s2 + $0x280] sm:$0xff]  ;;  %v484_v60 = vld [vmem:[%s1773_s2 + $0x268] sm:$0xff] }
  0x38   :  { %949 = vmatprep.subr.mxu0 %v111_v27  ;;  %562 = vmatprep.subr.mxu1 %v492_v54  ;;  %v486_v61 = vld [vmem:[%s1773_s2 + $0x278] sm:$0xff]  ;;  %v480_v63 = vld [vmem:[%s1773_s2 + $0x248] sm:$0xff]  ;;  %v477_v0 = vld [vmem:[%s1773_s2 + $0x230] sm:$0xff] }
  0x39   :  { %950 = vmatpush3.msra.mxu0 %v95_v28  ;;  %563 = vmatpush1.msra.mxu1 %v491_v56  ;;  %v478_v62 = vld [vmem:[%s1773_s2 + $0x238] sm:$0xff]  ;;  %v479_v1 = vld [vmem:[%s1773_s2 + $0x240] sm:$0xff]  ;;  %v473_v3 = vld [vmem:[%s1773_s2 + $0x210] sm:$0xff] }
  0x3a   :  { %951 = vmatprep.subr.mxu0 %v110_v29  ;;  %564 = vmatprep.subr.mxu1 %v485_v58  ;;  %v471_v2 = vld [vmem:[%s1773_s2 + $0x200] sm:$0xff]  ;;  %v470_v4 = vld [vmem:[%s1773_s2 + $0x1f8] sm:$0xff]  ;;  %v472_v5 = vld [vmem:[%s1773_s2 + $0x208] sm:$0xff] }
  0x3b   :  { %952 = vmatpush3.msra.mxu0 %v94_v30  ;;  %565 = vmatpush1.msra.mxu1 %v484_v60  ;;  %v464_v6 = vld [vmem:[%s1773_s2 + $0x1c8] sm:$0xff]  ;;  %v466_v7 = vld [vmem:[%s1773_s2 + $0x1d8] sm:$0xff]  ;;  %v463_v8 = vld [vmem:[%s1773_s2 + $0x1c0] sm:$0xff] }
  0x3c   :  { %953 = vmatprep.subr.mxu0 %v109_v31  ;;  %566 = vmatprep.subr.mxu1 %v478_v62  ;;  %v465_v9 = vld [vmem:[%s1773_s2 + $0x1d0] sm:$0xff]  ;;  %v459_v12 = vld [vmem:[%s1773_s2 + $0x1a0] sm:$0xff]  ;;  %v456_v13 = vld [vmem:[%s1773_s2 + $0x188] sm:$0xff] }
  0x3d   :  { %954 = vmatpush3.msra.mxu0 %v93_v32  ;;  %567 = vmatpush1.msra.mxu1 %v477_v0  ;;  %v457_v10 = vld [vmem:[%s1773_s2 + $0x190] sm:$0xff]  ;;  %v458_v14 = vld [vmem:[%s1773_s2 + $0x198] sm:$0xff]  ;;  %v452_v16 = vld [vmem:[%s1773_s2 + $0x168] sm:$0xff] }
  0x3e   :  { %955 = vmatprep.subr.mxu0 %v108_v33  ;;  %568 = vmatprep.subr.mxu1 %v471_v2  ;;  %v450_v15 = vld [vmem:[%s1773_s2 + $0x158] sm:$0xff]  ;;  %v449_v17 = vld [vmem:[%s1773_s2 + $0x150] sm:$0xff]  ;;  %v451_v18 = vld [vmem:[%s1773_s2 + $0x160] sm:$0xff] }
  0x3f   :  { %956 = vmatpush3.msra.mxu0 %v92_v34  ;;  %569 = vmatpush1.msra.mxu1 %v470_v4  ;;  %v443_v19 = vld [vmem:[%s1773_s2 + $0x120] sm:$0xff]  ;;  %v445_v20 = vld [vmem:[%s1773_s2 + $0x130] sm:$0xff]  ;;  %v442_v21 = vld [vmem:[%s1773_s2 + $0x118] sm:$0xff] }
  0x40   :  { %957 = vmatprep.subr.mxu0 %v107_v35  ;;  %570 = vmatprep.subr.mxu1 %v464_v6  ;;  %v444_v22 = vld [vmem:[%s1773_s2 + $0x128] sm:$0xff]  ;;  %v438_v24 = vld [vmem:[%s1773_s2 + $0xf8] sm:$0xff]  ;;  %v435_v25 = vld [vmem:[%s1773_s2 + $0xe0] sm:$0xff] }
  0x41   :  { %958 = vmatpush3.msra.mxu0 %v91_v36  ;;  %571 = vmatpush1.msra.mxu1 %v463_v8  ;;  %v436_v23 = vld [vmem:[%s1773_s2 + $0xe8] sm:$0xff]  ;;  %v437_v26 = vld [vmem:[%s1773_s2 + $0xf0] sm:$0xff]  ;;  %v431_v28 = vld [vmem:[%s1773_s2 + $0xc0] sm:$0xff] }
  0x42   :  { %959 = vmatprep.subr.mxu0 %v106_v37  ;;  %572 = vmatprep.subr.mxu1 %v457_v10  ;;  %v429_v27 = vld [vmem:[%s1773_s2 + $0xb0] sm:$0xff]  ;;  %v428_v29 = vld [vmem:[%s1773_s2 + $0xa8] sm:$0xff]  ;;  %v430_v30 = vld [vmem:[%s1773_s2 + $0xb8] sm:$0xff] }
  0x43   :  { %960 = vmatpush3.msra.mxu0 %v90_v38  ;;  %573 = vmatpush1.msra.mxu1 %v456_v13  ;;  %v422_v31 = vld [vmem:[%s1773_s2 + $0x78] sm:$0xff]  ;;  %v424_v32 = vld [vmem:[%s1773_s2 + $0x88] sm:$0xff]  ;;  %v421_v33 = vld [vmem:[%s1773_s2 + $0x70] sm:$0xff] }
  0x44   :  { %961 = vmatprep.subr.mxu0 %v105_v39  ;;  %574 = vmatprep.subr.mxu1 %v450_v15  ;;  %v423_v34 = vld [vmem:[%s1773_s2 + $0x80] sm:$0xff]  ;;  %v417_v36 = vld [vmem:[%s1773_s2 + $0x50] sm:$0xff]  ;;  %v414_v37 = vld [vmem:[%s1773_s2 + $0x38] sm:$0xff] }
  0x45   :  { %962 = vmatpush3.msra.mxu0 %v89_v40  ;;  %575 = vmatpush1.msra.mxu1 %v449_v17  ;;  %v415_v35 = vld [vmem:[%s1773_s2 + $0x40] sm:$0xff]  ;;  %v416_v38 = vld [vmem:[%s1773_s2 + $0x48] sm:$0xff]  ;;  %v410_v40 = vld [vmem:[%s1773_s2 + $0x18] sm:$0xff] }
  0x46   :  { %332 = vmatmul.mubr.f32.vlgmr.msra.gmra.mxu0 %v22_v41  ;;  %627 = vmatprep.subr.mxu0 %v515_v43  ;;  %v408_v39 = vld [vmem:[%s1773_s2 + $0x8] sm:$0xff]  ;;  %v407_v41 = vld [vmem:[%s1773_s2] sm:$0xff]  ;;  %v409_v42 = vld [vmem:[%s1773_s2 + $0x10] sm:$0xff] }
  0x47   :  { %691 = vmatprep.mubr.f32.mxu0 %v1053_v11  ;;  %628 = vmatpush1.msra.mxu0 %v514_v45  ;;  %v517_v43 = vld [vmem:[%s1773_s2 + $0x370] sm:$0xff]  ;;  %v516_v58 = vld [vmem:[%s1773_s2 + $0x368] sm:$0xff]  ;;  %v510_v60 = vld [vmem:[%s1773_s2 + $0x338] sm:$0xff] }
  0x48   :  { %629 = vmatprep.subr.mxu0 %v508_v47  ;;  %576 = vmatprep.subr.mxu1 %v443_v19  ;;  %v511_v62 = vld [vmem:[%s1773_s2 + $0x340] sm:$0xff]  ;;  %v502_v0 = vld [vmem:[%s1773_s2 + $0x2f8] sm:$0xff]  ;;  %v496_v2 = vld [vmem:[%s1773_s2 + $0x2c8] sm:$0xff] }
  0x49   :  { %630 = vmatpush1.msra.mxu0 %v507_v49  ;;  %577 = vmatpush1.msra.mxu1 %v442_v21  ;;  %v497_v4 = vld [vmem:[%s1773_s2 + $0x2d0] sm:$0xff]  ;;  %v488_v6 = vld [vmem:[%s1773_s2 + $0x288] sm:$0xff]  ;;  %v482_v8 = vld [vmem:[%s1773_s2 + $0x258] sm:$0xff] }
  0x4a   :  { %631 = vmatprep.subr.mxu0 %v501_v51  ;;  %578 = vmatprep.subr.mxu1 %v436_v23  ;;  %v483_v10 = vld [vmem:[%s1773_s2 + $0x260] sm:$0xff]  ;;  %v474_v13 = vld [vmem:[%s1773_s2 + $0x218] sm:$0xff]  ;;  %v468_v15 = vld [vmem:[%s1773_s2 + $0x1e8] sm:$0xff] }
  0x4b   :  { %632 = vmatpush1.msra.mxu0 %v500_v53  ;;  %579 = vmatpush1.msra.mxu1 %v435_v25  ;;  %v469_v17 = vld [vmem:[%s1773_s2 + $0x1f0] sm:$0xff]  ;;  %v460_v19 = vld [vmem:[%s1773_s2 + $0x1a8] sm:$0xff]  ;;  %v454_v21 = vld [vmem:[%s1773_s2 + $0x178] sm:$0xff] }
  0x4c   :  { %633 = vmatprep.subr.mxu0 %v494_v55  ;;  %580 = vmatprep.subr.mxu1 %v429_v27  ;;  %v455_v23 = vld [vmem:[%s1773_s2 + $0x180] sm:$0xff]  ;;  %v446_v25 = vld [vmem:[%s1773_s2 + $0x138] sm:$0xff]  ;;  %v440_v27 = vld [vmem:[%s1773_s2 + $0x108] sm:$0xff] }
  0x4d   :  { %634 = vmatpush1.msra.mxu0 %v493_v57  ;;  %581 = vmatpush1.msra.mxu1 %v428_v29  ;;  %v441_v29 = vld [vmem:[%s1773_s2 + $0x110] sm:$0xff] }
  0x4e   :  { %635 = vmatprep.subr.mxu0 %v487_v59  ;;  %582 = vmatprep.subr.mxu1 %v422_v31  ;;  %v518_v59 = vld [vmem:[%s1773_s2 + $0x378] sm:$0xff]  ;;  %v432_v31 = vld [vmem:[%s1773_s2 + $0xc8] sm:$0xff] }
  0x4f   :  { %636 = vmatpush1.msra.mxu0 %v486_v61  ;;  %583 = vmatpush1.msra.mxu1 %v421_v33  ;;  %v509_v61 = vld [vmem:[%s1773_s2 + $0x330] sm:$0xff]  ;;  %v426_v33 = vld [vmem:[%s1773_s2 + $0x98] sm:$0xff] }
  0x50   :  { %637 = vmatprep.subr.mxu0 %v480_v63  ;;  %584 = vmatprep.subr.mxu1 %v415_v35  ;;  %v503_v63 = vld [vmem:[%s1773_s2 + $0x300] sm:$0xff] }
  0x51   :  { %638 = vmatpush1.msra.mxu0 %v479_v1  ;;  %585 = vmatpush1.msra.mxu1 %v414_v37  ;;  %v504_v1 = vld [vmem:[%s1773_s2 + $0x308] sm:$0xff]  ;;  %v427_v35 = vld [vmem:[%s1773_s2 + $0xa0] sm:$0xff]  ;;  %v418_v37 = vld [vmem:[%s1773_s2 + $0x58] sm:$0xff] }
  0x52   :  { %639 = vmatprep.subr.mxu0 %v473_v3  ;;  %586 = vmatprep.subr.mxu1 %v408_v39  ;;  %v495_v3 = vld [vmem:[%s1773_s2 + $0x2c0] sm:$0xff]  ;;  %v412_v39 = vld [vmem:[%s1773_s2 + $0x28] sm:$0xff] }
  0x53   :  { %640 = vmatpush1.msra.mxu0 %v472_v5  ;;  %587 = vmatpush1.msra.mxu1 %v407_v41  ;;  %v489_v5 = vld [vmem:[%s1773_s2 + $0x290] sm:$0xff] }
  0x54   :  { %641 = vmatprep.subr.mxu0 %v466_v7  ;;  %698 = vmatprep.subr.mxu1 %v517_v43  ;;  %v490_v7 = vld [vmem:[%s1773_s2 + $0x298] sm:$0xff]  ;;  %v413_v41 = vld [vmem:[%s1773_s2 + $0x30] sm:$0xff] }
  0x55   :  { %642 = vmatpush1.msra.mxu0 %v465_v9  ;;  %v481_v9 = vld [vmem:[%s1773_s2 + $0x250] sm:$0xff] }
  0x56   :  { %643 = vmatprep.subr.mxu0 %v459_v12  ;;  %v475_v12 = vld [vmem:[%s1773_s2 + $0x220] sm:$0xff] }
  0x57   :  { %644 = vmatpush1.msra.mxu0 %v458_v14  ;;  %v476_v14 = vld [vmem:[%s1773_s2 + $0x228] sm:$0xff] }
  0x58   :  { %645 = vmatprep.subr.mxu0 %v452_v16  ;;  %v467_v16 = vld [vmem:[%s1773_s2 + $0x1e0] sm:$0xff] }
  0x59   :  { %646 = vmatpush1.msra.mxu0 %v451_v18  ;;  %v461_v18 = vld [vmem:[%s1773_s2 + $0x1b0] sm:$0xff] }
  0x5a   :  { %647 = vmatprep.subr.mxu0 %v445_v20  ;;  %v462_v20 = vld [vmem:[%s1773_s2 + $0x1b8] sm:$0xff] }
  0x5b   :  { %648 = vmatpush1.msra.mxu0 %v444_v22  ;;  %v453_v22 = vld [vmem:[%s1773_s2 + $0x170] sm:$0xff] }
  0x5c   :  { %649 = vmatprep.subr.mxu0 %v438_v24  ;;  %v447_v24 = vld [vmem:[%s1773_s2 + $0x140] sm:$0xff] }
  0x5d   :  { %650 = vmatpush1.msra.mxu0 %v437_v26  ;;  %v448_v26 = vld [vmem:[%s1773_s2 + $0x148] sm:$0xff] }
  0x5e   :  { %651 = vmatprep.subr.mxu0 %v431_v28  ;;  %v439_v28 = vld [vmem:[%s1773_s2 + $0x100] sm:$0xff] }
  0x5f   :  { %652 = vmatpush1.msra.mxu0 %v430_v30  ;;  %v433_v30 = vld [vmem:[%s1773_s2 + $0xd0] sm:$0xff] }
  0x60   :  { %653 = vmatprep.subr.mxu0 %v424_v32  ;;  %v434_v32 = vld [vmem:[%s1773_s2 + $0xd8] sm:$0xff] }
  0x61   :  { %654 = vmatpush1.msra.mxu0 %v423_v34  ;;  %v425_v34 = vld [vmem:[%s1773_s2 + $0x90] sm:$0xff] }
  0x62   :  { %655 = vmatprep.subr.mxu0 %v417_v36  ;;  %v419_v36 = vld [vmem:[%s1773_s2 + $0x60] sm:$0xff] }
  0x63   :  { %656 = vmatpush1.msra.mxu0 %v416_v38  ;;  %v420_v38 = vld [vmem:[%s1773_s2 + $0x68] sm:$0xff] }
  0x64   :  { %657 = vmatprep.subr.mxu0 %v410_v40  ;;  %v411_v40 = vld [vmem:[%s1773_s2 + $0x20] sm:$0xff] }
  0x65   :  { %658 = vmatpush1.msra.mxu0 %v409_v42  ;;  %v521_v42 = vlaneseq }
  0x66   :  { %993 = vmatprep.subr.mxu0 %v1053_v11 }
  0x67   :  { %v522_v43 = vshrl.u32 %v521_v42, 7 }
  0xe4   :  { %v893_v48 = vpop.f32.mrf.mxu0 }
  0xe5   :  { %v928_v44 = vpop.f32.mrf.mxu1 }
  0xe6   :  { %v894_v49 = vpop.f32.mrf.mxu0 }
  0xe7   :  { %v929_v45 = vpop.f32.mrf.mxu1  ;;  %v895_v50 = vadd.f32 %v894_v49, %v893_v48  ;;  %v535_v48 = vsub.s32 3, %v522_v43 }
  0xe8   :  { %v930_v51 = vadd.f32 %v929_v45, %v928_v44  ;;  %v523_v44 = vsub.s32 0, %v522_v43  ;;  %v531_v45 = vsub.s32 2, %v522_v43 }
  0xea   :  { %v264_v54 = vadd.f32 %v930_v51, %v895_v50 }
  0xed   :  { %v403_v46 = vpop.f32.mrf.mxu1 }
  0xef   :  { %v992_v47 = vpop.f32.mrf.mxu1 }
  0xf0   :  { %v527_v47 = vsub.s32 1, %v522_v43 }
 0x106   :  { %v963_v52 = vpop.f32.mrf.mxu0 }
 0x108   :  { %v964_v53 = vpop.f32.mrf.mxu0 }
 0x109   :  { %v965_v55 = vadd.f32 %v964_v53, %v963_v52 }
 0x10b   :  { %v334_v56 = vadd.f32 %v965_v55, %v264_v54 }
 0x10d   :  { %v1599_v57 = vadd.f32 %v403_v46, %v334_v56  ;;  %v519_v46 = vld [vmem:[%s1774_s3] sm:$0x7f]  ;;  %s1055_s3 = smov [#allocation2]  }
 0x10e   :  { %v524_v49 = vrot.slane %v519_v46, %v523_v44  ;;  %v532_v50 = vrot.slane %v519_v46, %v531_v45  ;;  %v528_v51 = vrot.slane %v519_v46, %v527_v47  ;;  %v536_v52 = vrot.slane %v519_v46, %v535_v48  ;;  %s852_s18 = sshll.u32 %s1055_s3, 4  ;;  %s853_s18 = int_to_ptr.vmem [resolvable:$true] %s852_s18 }
 0x10f   :  { %621 = vmatmul.mubr.f32.vlgmr.msra.gmra.mxu1 %v1599_v57  ;;  %692 = vmatmul.mubr.f32.vlgmr.msra.gmra.mxu0 %v1599_v57  ;;  %s1031_s19 = scalar_lea.vmem %s853_s18, 896  ;;  %p1036_p1 = scmp.lt.s32.totalorder %s853_s18, %s853_s18 }
 0x110   :  { %699 = vmatpush1.msra.mxu1 %v516_v58  ;;  %994 = vmatpush3.msra.mxu0 %v518_v59  ;;  %p1032_p0 = scmp.ne.s32.totalorder %s853_s18, %s1031_s19  ;;  %p1037_p2 = scmp.lt.s32.totalorder %s1031_s19, %s1031_s19 }
 0x111   :  { %700 = vmatprep.subr.mxu1 %v510_v60  ;;  %995 = vmatprep.subr.mxu0 %v1053_v11  ;;  %v539_v60 = vsub.s32 4, %v522_v43 }
 0x112   :  { %701 = vmatpush1.msra.mxu1 %v509_v61  ;;  %996 = vmatpush3.msra.mxu0 %v511_v62  ;;  %v547_v61 = vsub.s32 6, %v522_v43  ;;  %v543_v62 = vsub.s32 5, %v522_v43  ;;  %p1038_p3 = por %p1037_p2, %p1036_p1 }
 0x113   :  { %702 = vmatprep.subr.mxu1 %v503_v63  ;;  %997 = vmatprep.subr.mxu0 %v1053_v11  ;;  %v540_v63 = vrot.slane %v519_v46, %v539_v60 }
 0x114   :  { %703 = vmatpush1.msra.mxu1 %v502_v0  ;;  %998 = vmatpush3.msra.mxu0 %v504_v1  ;;  %v548_v0 = vrot.slane %v519_v46, %v547_v61  ;;  %v544_v1 = vrot.slane %v519_v46, %v543_v62  ;;  %p1039_p4 = pnand %p1038_p3, %p1032_p0 }
 0x115   :  { %704 = vmatprep.subr.mxu1 %v496_v2  ;;  %999 = vmatprep.subr.mxu0 %v1053_v11 }
 0x116   :  { %705 = vmatpush1.msra.mxu1 %v495_v3  ;;  %1000 = vmatpush3.msra.mxu0 %v497_v4 }
 0x117   :  { %706 = vmatprep.subr.mxu1 %v489_v5  ;;  %1001 = vmatprep.subr.mxu0 %v1053_v11 }
 0x118   :  { %707 = vmatpush1.msra.mxu1 %v488_v6  ;;  %1002 = vmatpush3.msra.mxu0 %v490_v7 }
 0x119   :  { %708 = vmatprep.subr.mxu1 %v482_v8  ;;  %1003 = vmatprep.subr.mxu0 %v1053_v11 }
 0x11a   :  { %709 = vmatpush1.msra.mxu1 %v481_v9  ;;  %1004 = vmatpush3.msra.mxu0 %v483_v10 }
 0x11b   :  { %710 = vmatprep.subr.mxu1 %v475_v12  ;;  %1005 = vmatprep.subr.mxu0 %v1053_v11 }
 0x11c   :  { %711 = vmatpush1.msra.mxu1 %v474_v13  ;;  %1006 = vmatpush3.msra.mxu0 %v476_v14 }
 0x11d   :  { %712 = vmatprep.subr.mxu1 %v468_v15  ;;  %1007 = vmatprep.subr.mxu0 %v1053_v11 }
 0x11e   :  { %713 = vmatpush1.msra.mxu1 %v467_v16  ;;  %1008 = vmatpush3.msra.mxu0 %v469_v17 }
 0x11f   :  { %714 = vmatprep.subr.mxu1 %v461_v18  ;;  %1009 = vmatprep.subr.mxu0 %v1053_v11 }
 0x120   :  { %715 = vmatpush1.msra.mxu1 %v460_v19  ;;  %1010 = vmatpush3.msra.mxu0 %v462_v20 }
 0x121   :  { %716 = vmatprep.subr.mxu1 %v454_v21  ;;  %1011 = vmatprep.subr.mxu0 %v1053_v11 }
 0x122   :  { %717 = vmatpush1.msra.mxu1 %v453_v22  ;;  %1012 = vmatpush3.msra.mxu0 %v455_v23 }
 0x123   :  { %718 = vmatprep.subr.mxu1 %v447_v24  ;;  %1013 = vmatprep.subr.mxu0 %v1053_v11 }
 0x124   :  { %719 = vmatpush1.msra.mxu1 %v446_v25  ;;  %1014 = vmatpush3.msra.mxu0 %v448_v26 }
 0x125   :  { %720 = vmatprep.subr.mxu1 %v440_v27  ;;  %1015 = vmatprep.subr.mxu0 %v1053_v11 }
 0x126   :  { %721 = vmatpush1.msra.mxu1 %v439_v28  ;;  %1016 = vmatpush3.msra.mxu0 %v441_v29 }
 0x127   :  { %722 = vmatprep.subr.mxu1 %v433_v30  ;;  %1017 = vmatprep.subr.mxu0 %v1053_v11 }
 0x128   :  { %723 = vmatpush1.msra.mxu1 %v432_v31  ;;  %1018 = vmatpush3.msra.mxu0 %v434_v32 }
 0x129   :  { %724 = vmatprep.subr.mxu1 %v426_v33  ;;  %1019 = vmatprep.subr.mxu0 %v1053_v11 }
 0x12a   :  { %725 = vmatpush1.msra.mxu1 %v425_v34  ;;  %1020 = vmatpush3.msra.mxu0 %v427_v35 }
 0x12b   :  { %726 = vmatprep.subr.mxu1 %v419_v36  ;;  %1021 = vmatprep.subr.mxu0 %v1053_v11 }
 0x12c   :  { %727 = vmatpush1.msra.mxu1 %v418_v37  ;;  %1022 = vmatpush3.msra.mxu0 %v420_v38 }
 0x12d   :  { %728 = vmatprep.subr.mxu1 %v412_v39  ;;  %1023 = vmatprep.subr.mxu0 %v1053_v11 }
 0x12e   :  { %729 = vmatpush1.msra.mxu1 %v411_v40  ;;  %762 = vmatprep.mubr.f32.mxu1 %v1053_v11 }
 0x12f   :  { %1024 = vmatpush3.msra.mxu0 %v413_v41  ;;  %1025 = vmatprep.mubr.msk.f32.mxu0 %vm1054_vm1, %v1053_v11 }
 0x130   :  { %763 = vmatmul.mubr.f32.vlgmr.msra.gmra.mxu1 %v1599_v57  ;;  %1026 = vmatmul.mubr.f32.vlgmr.msra.gmra.mxu0 %v1599_v57 }
 0x1cf   :  { %v622_v53 = vpop.f32.mrf.mxu1  ;;  %v693_v11 = vpop.f32.mrf.mxu0 }
 0x1d0   :  { %v623_v54 = vadd.f32 %v622_v53, %v524_v49  ;;  %v694_v55 = vadd.f32 %v693_v11, %v532_v50 }
 0x1d1   :  { %v624_v56 = vpop.f32.mrf.mxu1  ;;  %v695_v57 = vpop.f32.mrf.mxu0 }
 0x1d2   :  { %839 = vst [vmem:[#allocation2] sm:$0xff] %v623_v54  ;;  %841 = vst [vmem:[#allocation2 + $0x10] sm:$0xff] %v694_v55  ;;  %v625_v58 = vadd.f32 %v624_v56, %v528_v51  ;;  %v696_v59 = vadd.f32 %v695_v57, %v536_v52 }
 0x1d4   :  { %840 = vst [vmem:[#allocation2 + $0x8] sm:$0xff] %v625_v58  ;;  %842 = vst [vmem:[#allocation2 + $0x18] sm:$0xff] %v696_v59 }
 0x1f0   :  { %v764_v2 = vpop.f32.mrf.mxu1  ;;  %v835_v3 = vpop.f32.mrf.mxu0 }
 0x1f1   :  { %v765_v4 = vadd.f32 %v764_v2, %v540_v63  ;;  %v836_v5 = vadd.f32 %v835_v3, %v548_v0 }
 0x1f2   :  { %v766_v6 = vpop.f32.mrf.mxu1  ;;  %v1027_v7 = vpop.f32.mrf.mxu0 }
 0x1f3   :  { %843 = vst [vmem:[#allocation2 + $0x20] sm:$0xff] %v765_v4  ;;  %845 = vst.msk [vmem:[#allocation2 + $0x30] sm:$0xff] %vm123_vm0, %v836_v5  ;;  %v767_v8 = vadd.f32 %v766_v6, %v544_v1 }
 0x1f5   :  { %844 = vst [vmem:[#allocation2 + $0x28] sm:$0xff] %v767_v8 }
 0x1f6   :  { %1042 = shalt.err (!%p1039_p4)
}
 0x1f7   :  { %855 = dma.vmem_to_hbm [thread:$0]  %s853_s18, 896, %s1775_s4, [#allocation3]  }
 0x1f8   :  { %1051 = dma.done.wait [#allocation3], 896  }
 0x1f9   :  { %1052 = vsyncadd [#allocation3], 4294966400 }
 0x1fa   :  { %859 = vsyncpa [#allocation3], 1 }

</bundles_post_ra>
